<compile_context>
chip_gen: v6e
topology: v6e:2x2x1
jax: 0.10.0
libtpu: 0.0.40
codegen_flags: <defaults>
</compile_context>

<pallas_src>
from functools import partial

import jax
import jax.numpy as jnp
from jax import lax
from jax.experimental import pallas as pl
from jax.experimental.pallas import tpu as pltpu


def _softmax_layer_kernel(x_ref, wt_ref, winv_ref, o_ref, *, n_real, n_cols):
    # x_ref:    (TM, K)       streamed row tile of activations
    # wt_ref:   (K, N_pad)    resident, pre-transposed, UN-normalized weight
    # winv_ref: (1, N_pad)    precomputed per-row (now per-column) inverse norms
    # o_ref:    (TM, N_pad)   lane-dense output tile
    x = x_ref[...].astype(jnp.float32)

    # F.normalize(x, dim=-1) * 10.  rsqrt(max(ssq, eps^2)) == 1/max(||x||, eps)
    # (sqrt is monotone), rsqrt runs on the EUP, multiply on the VPU.
    eps_sq = jnp.float32(1e-24)
    x_inv = lax.rsqrt(jnp.maximum(jnp.sum(x * x, axis=-1, keepdims=True), eps_sq))
    x = x * (x_inv * jnp.float32(10.0))

    # MXU-natural (M,K) x (K,N) contraction; f32 accumulation.
    wt = wt_ref[...].astype(jnp.float32)
    logits = lax.dot_general(
        x, wt,
        dimension_numbers=(((1,), (0,)), ((), ())),
        preferred_element_type=jnp.float32,
    )

    # Apply W's row normalization to the logit columns (cheap TM x N broadcast
    # multiply instead of re-normalizing W every step).
    logits = logits * winv_ref[...].astype(jnp.float32)

    # Mask lane-padding columns so they cannot corrupt the softmax denominator.
    if n_real != n_cols:
        col = lax.broadcasted_iota(jnp.int32, logits.shape, 1)
        logits = jnp.where(col < n_real, logits, jnp.float32(-1e30))

    # Numerically stable log_softmax along the lane axis.
    m = jnp.max(logits, axis=-1, keepdims=True)
    z = logits - m
    lse = jnp.log(jnp.sum(jnp.exp(z), axis=-1, keepdims=True))
    o_ref[...] = (z - lse).astype(o_ref.dtype)


def _round_up(x, m):
    return ((x + m - 1) // m) * m


def _vmem_capacity_bytes():
    # Trace-time hardware query; fall back to the smallest per-core VMEM in
    # the fleet (v7x: 64 MiB per TensorCore) if unavailable.
    try:
        return int(pltpu.get_tpu_info().vmem_capacity_bytes)
    except Exception:
        return 64 * 1024 * 1024


def softmax_layer_forward(x, W, *, max_rows_per_tile=1024):
    """x: [n, input_dims] or [input_dims]; W: [output_dims, input_dims]."""
    single = (x.ndim == 1)
    if single:
        x = x[None, :]
    n, input_dims = x.shape
    output_dims, w_in = W.shape
    if w_in != input_dims:
        raise TypeError(f"The inputs must have size {w_in}")

    # ---- one-time weight preprocessing (tiny XLA ops, outside the kernel) --
    n_cols = _round_up(output_dims, 128)          # lane-dense output width

    w_f32 = W.astype(jnp.float32)
    w_inv = lax.rsqrt(
        jnp.maximum(jnp.sum(w_f32 * w_f32, axis=1), jnp.float32(1e-24)))
    if n_cols != output_dims:
        w_inv = jnp.pad(w_inv, (0, n_cols - output_dims), constant_values=1.0)
    w_inv_row = w_inv.reshape(1, n_cols)

    w_t = jnp.transpose(W, (1, 0))                # (K, N): MXU-natural rhs
    if n_cols != output_dims:
        w_t = jnp.pad(w_t, ((0, 0), (0, n_cols - output_dims)))

    # ---- generation-aware VMEM budget & row-tile sizing --------------------
    vmem_cap = _vmem_capacity_bytes()
    # ~48 MiB on v7x (64 MiB/TC), capped at 64 MiB on v5e/v6e (128 MiB).
    vmem_limit = int(min((vmem_cap * 3) // 4, 64 * 1024 * 1024))

    w_itemsize = jnp.dtype(W.dtype).itemsize
    x_itemsize = jnp.dtype(x.dtype).itemsize
    # Count W at 2 buffers (conservative: keeps the Buffered(1)-unsupported
    # fallback within budget too) plus the tiny w_inv row.
    resident_bytes = 2 * w_itemsize * input_dims * n_cols + 2 * 4 * n_cols
    headroom = 2 * 1024 * 1024
    stream_budget = vmem_limit - resident_bytes - headroom
    if stream_budget <= 0:
        # TODO(synk): N-tiled online-logsumexp variant for non-resident W.
        raise NotImplementedError(
            "W is too large to keep resident in VMEM for this kernel")

    # Per-row bytes: double-buffered x-in + out streams, plus f32 temporaries
    # (normalized x and logits) materialized inside the kernel.
    per_row_bytes = (2 * x_itemsize * (input_dims + n_cols)
                     + 4 * (input_dims + 2 * n_cols))
    tm = int(min(max_rows_per_tile, max(8, stream_budget // per_row_bytes)))
    if tm >= 256:
        tm = (tm // 256) * 256        # whole MXU passes on v6e/v7x
    elif tm >= 128:
        tm = 128                      # whole MXU pass on v5e
    else:
        tm = max(8, (tm // 8) * 8)    # sublane-aligned
    tm = min(tm, _round_up(n, 8))     # don't tile past the data

    # Pad rows so the grid divides evenly. Zero rows normalize to zero (eps
    # clamp), give finite log-probs, and are sliced off below.
    n_rows = _round_up(n, tm)
    if n_rows != n:
        x = jnp.pad(x, ((0, n_rows - n), (0, 0)))

    grid = (n_rows // tm,)
    kernel = partial(_softmax_layer_kernel, n_real=output_dims, n_cols=n_cols)

    def _call(w_single_buffered):
        # Resident weight: same block every step -> fetched once; request a
        # single buffer so it doesn't occupy 2x its size in VMEM.
        w_spec_kwargs = (
            {"pipeline_mode": pl.Buffered(1)} if w_single_buffered else {})
        return pl.pallas_call(
            kernel,
            out_shape=jax.ShapeDtypeStruct((n_rows, n_cols), x.dtype),
            grid_spec=pltpu.PrefetchScalarGridSpec(
                num_scalar_prefetch=0,
                grid=grid,
                in_specs=[
                    # Streamed row tile of activations (double-buffered).
                    pl.BlockSpec((tm, input_dims), lambda i: (i, 0)),
                    # Resident pre-transposed weight.
                    pl.BlockSpec((input_dims, n_cols), lambda i: (0, 0),
                                 **w_spec_kwargs),
                    # Resident per-column inverse norms.
                    pl.BlockSpec((1, n_cols), lambda i: (0, 0)),
                ],
                out_specs=pl.BlockSpec((tm, n_cols), lambda i: (i, 0)),
            ),
            compiler_params=pltpu.CompilerParams(
                # Row tiles are independent -> shard across TensorCores (v7x).
                dimension_semantics=("parallel",),
                vmem_limit_bytes=vmem_limit,
            ),
        )(x, w_t, w_inv_row)

    try:
        out = _call(True)
    except Exception:
        # Older Pallas without single-buffer pipeline_mode support.
        out = _call(False)

    out = out[:n, :output_dims]
    return out[0] if single else out


def _reference(x, W):
    eps = 1e-12
    xn = x / jnp.maximum(jnp.linalg.norm(x, axis=-1, keepdims=True), eps) * 10.0
    Wn = W / jnp.maximum(jnp.linalg.norm(W, axis=-1, keepdims=True), eps)
    return jax.nn.log_softmax(xn @ Wn.T, axis=-1)


if __name__ == "__main__":
    n, input_dims, output_dims = 8, 32, 16

    key = jax.random.PRNGKey(0)
    kx, kw, kx2, kw2 = jax.random.split(key, 4)

    x = jax.random.normal(kx, (n, input_dims), dtype=jnp.float32)
    # torch.nn.init.normal_(W, std=0.01)
    W = 0.01 * jax.random.normal(kw, (output_dims, input_dims), dtype=jnp.float32)

    # Tolerance: f32 associativity differs from the reference (w_inv applied
    # to the logits after the matmul instead of to W before it).
    ATOL, RTOL = 1e-4, 1e-5

    # 1) small batch, non-lane-dense head (exercises N padding + masking)
    out = jax.block_until_ready(softmax_layer_forward(x, W))
    expected = _reference(x, W)
    assert out.shape == (n, output_dims)
    assert jnp.allclose(out, expected, atol=ATOL, rtol=RTOL), "batch mismatch"

    # 2) single-vector path
    out_vec = jax.block_until_ready(softmax_layer_forward(x[0], W))
    assert out_vec.shape == (output_dims,)
    assert jnp.allclose(out_vec, expected[0], atol=ATOL, rtol=RTOL), "vector mismatch"

    # 3) multi-tile path (row tiling, row padding, parallel grid)
    n2 = 200
    x2 = jax.random.normal(kx2, (n2, input_dims), dtype=jnp.float32)
    out2 = jax.block_until_ready(
        softmax_layer_forward(x2, W, max_rows_per_tile=64))
    expected2 = _reference(x2, W)
    assert out2.shape == (n2, output_dims)
    assert jnp.allclose(out2, expected2, atol=ATOL, rtol=RTOL), "tiled mismatch"

    # 4) lane-dense head (output_dims already a multiple of 128, no masking)
    out_dims3 = 256
    W3 = 0.01 * jax.random.normal(kw2, (out_dims3, input_dims), dtype=jnp.float32)
    out3 = jax.block_until_ready(softmax_layer_forward(x, W3))
    expected3 = _reference(x, W3)
    assert out3.shape == (n, out_dims3)
    assert jnp.allclose(out3, expected3, atol=ATOL, rtol=RTOL), "dense-head mismatch"

    print("KERNEL_OK")
</pallas_src>

<mosaic_0001>
module attributes {stable_mosaic.version = 11 : i64} {
  func.func @_softmax_layer_kernel(%arg0: i32, %arg1: memref<8x32xf32, #tpu.memory_space<vmem>>, %arg2: memref<32x128xf32, #tpu.memory_space<vmem>>, %arg3: memref<1x128xf32, #tpu.memory_space<vmem>>, %arg4: memref<8x128xf32, #tpu.memory_space<vmem>>) attributes {dimension_semantics = [#tpu.dimension_semantics<parallel>], iteration_bounds = array<i64: 1>, scalar_prefetch = 0 : i64, scratch_operands = 0 : i64, tpu.core_type = #tpu.core_type<tc>, window_params = [{transform_indices = @transform_0, window_bounds = array<i64: 8, 32>}, {pipeline_mode = #tpu.pipeline_mode<synchronous>, transform_indices = @transform_1, window_bounds = array<i64: 32, 128>}, {pipeline_mode = #tpu.pipeline_mode<synchronous>, transform_indices = @transform_2, window_bounds = array<i64: 1, 128>}, {transform_indices = @transform_3, window_bounds = array<i64: 8, 128>}]} {
    %c0 = arith.constant 0 : index
    %c0_0 = arith.constant 0 : index
    %0 = vector.load %arg1[%c0, %c0_0] : memref<8x32xf32, #tpu.memory_space<vmem>>, vector<8x32xf32>
    %1 = arith.mulf %0, %0 : vector<8x32xf32>
    %cst = arith.constant dense<0.000000e+00> : vector<8xf32>
    %2 = vector.multi_reduction <add>, %1, %cst [1] : vector<8x32xf32> to vector<8xf32>
    %3 = vector.shape_cast %2 : vector<8xf32> to vector<8x1xf32>
    %cst_1 = arith.constant 1.000000e-24 : f32
    %4 = vector.broadcast %cst_1 : f32 to vector<8x1xf32>
    %5 = arith.maximumf %3, %4 : vector<8x1xf32>
    %6 = math.rsqrt %5 : vector<8x1xf32>
    %cst_2 = arith.constant 1.000000e+01 : f32
    %7 = vector.broadcast %cst_2 : f32 to vector<8x1xf32>
    %8 = arith.mulf %6, %7 : vector<8x1xf32>
    %9 = vector.broadcast %8 : vector<8x1xf32> to vector<8x32xf32>
    %10 = arith.mulf %0, %9 : vector<8x32xf32>
    %c0_3 = arith.constant 0 : index
    %c0_4 = arith.constant 0 : index
    %11 = vector.load %arg2[%c0_3, %c0_4] : memref<32x128xf32, #tpu.memory_space<vmem>>, vector<32x128xf32>
    %cst_5 = arith.constant dense<0.000000e+00> : vector<8x128xf32>
    %12 = tpu.matmul %10, %11, %cst_5 {dimension_numbers = #tpu.dot_dimension_numbers<[1], [0], [0], [1], [0, 0, 1, 1], [], []>} : vector<8x32xf32>, vector<32x128xf32>, vector<8x128xf32> -> vector<8x128xf32>
    %c0_6 = arith.constant 0 : index
    %c0_7 = arith.constant 0 : index
    %13 = vector.load %arg3[%c0_6, %c0_7] : memref<1x128xf32, #tpu.memory_space<vmem>>, vector<1x128xf32>
    %14 = vector.broadcast %13 : vector<1x128xf32> to vector<8x128xf32>
    %15 = arith.mulf %12, %14 : vector<8x128xf32>
    %16 = tpu.iota {dimensions = array<i32: 1>} : vector<8x128xi32>
    %c16_i32 = arith.constant 16 : i32
    %17 = vector.broadcast %c16_i32 : i32 to vector<8x128xi32>
    %18 = arith.cmpi slt, %16, %17 : vector<8x128xi32>
    %cst_8 = arith.constant -1.000000e+30 : f32
    %19 = vector.broadcast %cst_8 : f32 to vector<8x128xf32>
    %20 = arith.select %18, %15, %19 : vector<8x128xi1>, vector<8x128xf32>
    %cst_9 = arith.constant dense<0xFF800000> : vector<8xf32>
    %21 = vector.multi_reduction <maximumf>, %20, %cst_9 [1] : vector<8x128xf32> to vector<8xf32>
    %22 = vector.shape_cast %21 : vector<8xf32> to vector<8x1xf32>
    %23 = vector.broadcast %22 : vector<8x1xf32> to vector<8x128xf32>
    %24 = arith.subf %20, %23 : vector<8x128xf32>
    %25 = math.exp %24 : vector<8x128xf32>
    %cst_10 = arith.constant dense<0.000000e+00> : vector<8xf32>
    %26 = vector.multi_reduction <add>, %25, %cst_10 [1] : vector<8x128xf32> to vector<8xf32>
    %27 = vector.shape_cast %26 : vector<8xf32> to vector<8x1xf32>
    %28 = math.log %27 : vector<8x1xf32>
    %29 = vector.broadcast %28 : vector<8x1xf32> to vector<8x128xf32>
    %30 = arith.subf %24, %29 : vector<8x128xf32>
    %c0_11 = arith.constant 0 : index
    %c0_12 = arith.constant 0 : index
    %31 = vector.load %arg4[%c0_11, %c0_12] : memref<8x128xf32, #tpu.memory_space<vmem>>, vector<8x128xf32>
    tpu.vector_store %arg4[%c0_11, %c0_12], %30 {strides = array<i32>} : memref<8x128xf32, #tpu.memory_space<vmem>>, vector<8x128xf32>,
    return
  }
  func.func @transform_0(%arg0: i32) -> (i32, i32) {
    %c0_i32 = arith.constant 0 : i32
    %c0_i32_0 = arith.constant 0 : i32
    return %arg0, %c0_i32 : i32, i32
  }
  func.func @transform_1(%arg0: i32) -> (i32, i32) {
    %c0_i32 = arith.constant 0 : i32
    %c0_i32_0 = arith.constant 0 : i32
    %c0_i32_1 = arith.constant 0 : i32
    return %c0_i32, %c0_i32_0 : i32, i32
  }
  func.func @transform_2(%arg0: i32) -> (i32, i32) {
    %c0_i32 = arith.constant 0 : i32
    %c0_i32_0 = arith.constant 0 : i32
    %c0_i32_1 = arith.constant 0 : i32
    return %c0_i32, %c0_i32_0 : i32, i32
  }
  func.func @transform_3(%arg0: i32) -> (i32, i32) {
    %c0_i32 = arith.constant 0 : i32
    %c0_i32_0 = arith.constant 0 : i32
    return %arg0, %c0_i32 : i32, i32
  }
}

module attributes {stable_mosaic.version = 11 : i64} {
  func.func @_softmax_layer_kernel(%arg0: i32, %arg1: memref<8x32xf32, #tpu.memory_space<vmem>>, %arg2: memref<32x128xf32, #tpu.memory_space<vmem>>, %arg3: memref<1x128xf32, #tpu.memory_space<vmem>>, %arg4: memref<8x128xf32, #tpu.memory_space<vmem>>) attributes {dimension_semantics = [#tpu.dimension_semantics<parallel>], iteration_bounds = array<i64: 1>, scalar_prefetch = 0 : i64, scratch_operands = 0 : i64, tpu.core_type = #tpu.core_type<tc>, window_params = [{transform_indices = @transform_0, window_bounds = array<i64: 8, 32>}, {pipeline_mode = #tpu.pipeline_mode<synchronous>, transform_indices = @transform_1, window_bounds = array<i64: 32, 128>}, {pipeline_mode = #tpu.pipeline_mode<synchronous>, transform_indices = @transform_2, window_bounds = array<i64: 1, 128>}, {transform_indices = @transform_3, window_bounds = array<i64: 8, 128>}]} {
    %c0 = arith.constant 0 : index
    %c0_0 = arith.constant 0 : index
    %0 = vector.load %arg1[%c0, %c0_0] : memref<8x32xf32, #tpu.memory_space<vmem>>, vector<8x32xf32>
    %1 = arith.mulf %0, %0 : vector<8x32xf32>
    %cst = arith.constant dense<0.000000e+00> : vector<8xf32>
    %2 = vector.multi_reduction <add>, %1, %cst [1] : vector<8x32xf32> to vector<8xf32>
    %3 = vector.shape_cast %2 : vector<8xf32> to vector<8x1xf32>
    %cst_1 = arith.constant 1.000000e-24 : f32
    %4 = vector.broadcast %cst_1 : f32 to vector<8x1xf32>
    %5 = arith.maximumf %3, %4 : vector<8x1xf32>
    %6 = math.rsqrt %5 : vector<8x1xf32>
    %cst_2 = arith.constant 1.000000e+01 : f32
    %7 = vector.broadcast %cst_2 : f32 to vector<8x1xf32>
    %8 = arith.mulf %6, %7 : vector<8x1xf32>
    %9 = vector.broadcast %8 : vector<8x1xf32> to vector<8x32xf32>
    %10 = arith.mulf %0, %9 : vector<8x32xf32>
    %c0_3 = arith.constant 0 : index
    %c0_4 = arith.constant 0 : index
    %11 = vector.load %arg2[%c0_3, %c0_4] : memref<32x128xf32, #tpu.memory_space<vmem>>, vector<32x128xf32>
    %cst_5 = arith.constant dense<0.000000e+00> : vector<8x128xf32>
    %12 = tpu.matmul %10, %11, %cst_5 {dimension_numbers = #tpu.dot_dimension_numbers<[1], [0], [0], [1], [0, 0, 1, 1], [], []>} : vector<8x32xf32>, vector<32x128xf32>, vector<8x128xf32> -> vector<8x128xf32>
    %c0_6 = arith.constant 0 : index
    %c0_7 = arith.constant 0 : index
    %13 = vector.load %arg3[%c0_6, %c0_7] : memref<1x128xf32, #tpu.memory_space<vmem>>, vector<1x128xf32>
    %14 = vector.broadcast %13 : vector<1x128xf32> to vector<8x128xf32>
    %15 = arith.mulf %12, %14 : vector<8x128xf32>
    %16 = tpu.iota {dimensions = array<i32: 1>} : vector<8x128xi32>
    %c16_i32 = arith.constant 16 : i32
    %17 = vector.broadcast %c16_i32 : i32 to vector<8x128xi32>
    %18 = arith.cmpi slt, %16, %17 : vector<8x128xi32>
    %cst_8 = arith.constant -1.000000e+30 : f32
    %19 = vector.broadcast %cst_8 : f32 to vector<8x128xf32>
    %20 = arith.select %18, %15, %19 : vector<8x128xi1>, vector<8x128xf32>
    %cst_9 = arith.constant dense<0xFF800000> : vector<8xf32>
    %21 = vector.multi_reduction <maximumf>, %20, %cst_9 [1] : vector<8x128xf32> to vector<8xf32>
    %22 = vector.shape_cast %21 : vector<8xf32> to vector<8x1xf32>
    %23 = vector.broadcast %22 : vector<8x1xf32> to vector<8x128xf32>
    %24 = arith.subf %20, %23 : vector<8x128xf32>
    %25 = math.exp %24 : vector<8x128xf32>
    %cst_10 = arith.constant dense<0.000000e+00> : vector<8xf32>
    %26 = vector.multi_reduction <add>, %25, %cst_10 [1] : vector<8x128xf32> to vector<8xf32>
    %27 = vector.shape_cast %26 : vector<8xf32> to vector<8x1xf32>
    %28 = math.log %27 : vector<8x1xf32>
    %29 = vector.broadcast %28 : vector<8x1xf32> to vector<8x128xf32>
    %30 = arith.subf %24, %29 : vector<8x128xf32>
    %c0_11 = arith.constant 0 : index
    %c0_12 = arith.constant 0 : index
    %31 = vector.load %arg4[%c0_11, %c0_12] : memref<8x128xf32, #tpu.memory_space<vmem>>, vector<8x128xf32>
    tpu.vector_store %arg4[%c0_11, %c0_12], %30 {strides = array<i32>} : memref<8x128xf32, #tpu.memory_space<vmem>>, vector<8x128xf32>,
    return
  }
  func.func @transform_0(%arg0: i32) -> (i32, i32) {
    %c0_i32 = arith.constant 0 : i32
    %c0_i32_0 = arith.constant 0 : i32
    return %arg0, %c0_i32 : i32, i32
  }
  func.func @transform_1(%arg0: i32) -> (i32, i32) {
    %c0_i32 = arith.constant 0 : i32
    %c0_i32_0 = arith.constant 0 : i32
    %c0_i32_1 = arith.constant 0 : i32
    return %c0_i32, %c0_i32_0 : i32, i32
  }
  func.func @transform_2(%arg0: i32) -> (i32, i32) {
    %c0_i32 = arith.constant 0 : i32
    %c0_i32_0 = arith.constant 0 : i32
    %c0_i32_1 = arith.constant 0 : i32
    return %c0_i32, %c0_i32_0 : i32, i32
  }
  func.func @transform_3(%arg0: i32) -> (i32, i32) {
    %c0_i32 = arith.constant 0 : i32
    %c0_i32_0 = arith.constant 0 : i32
    return %arg0, %c0_i32 : i32, i32
  }
}

</mosaic_0001>

<bundles_post_ra>
// kernel: tpu_custom_call.1
= control target key start
LH: loop header
LB: loop body
LE: loop exit
PB: predicated region body
PF: predicated region fallthrough
CT: control target
= control target key end

     0   :  { %8 = vsyncpa [#allocation3], 0  ;;  %s305_s0 = inlined_call_operand.hbm [shape: f32[8,32], index: 0, kind: input, shape index: {}]   ;;  %s306_s1 = inlined_call_operand.hbm [shape: f32[32,128], index: 1, kind: input, shape index: {}]   ;;  %s307_s2 = inlined_call_operand.vmem [shape: f32[1,128], index: 2, kind: input, shape index: {}]   ;;  %s308_s3 = inlined_call_operand.hbm [shape: f32[8,128], index: 3, kind: output, shape index: {}]  }
   0x1   :  { %9 = vsyncpa [#allocation6], 0 }
   0x2   :  { %10 = vsyncpa [#allocation4], 0  ;;  %s264_s12 = smov [#allocation2]   ;;  %s265_s14 = smov [#allocation5]  }
   0x3   :  { %s17_s13 = sshll.u32 %s264_s12, 4  ;;  %s26_s15 = sshll.u32 %s265_s14, 4  ;;  %s18_s13 = int_to_ptr.vmem [resolvable:$true] %s17_s13  ;;  %s27_s15 = int_to_ptr.vmem [resolvable:$true] %s26_s15 }
   0x4   :  { %s206_s16 = scalar_lea.vmem %s18_s13, 128  ;;  %p211_p1 = scmp.lt.s32.totalorder %s18_s13, %s18_s13 }
   0x5   :  { %p207_p0 = scmp.ne.s32.totalorder %s18_s13, %s206_s16  ;;  %p212_p2 = scmp.lt.s32.totalorder %s206_s16, %s206_s16 }
   0x7   :  { %p213_p3 = por %p212_p2, %p211_p1 }
   0x9   :  { %p214_p4 = pnand %p213_p3, %p207_p0 }
   0xb   :  { %217 = shalt.err (!%p214_p4)
}
   0xc   :  { %20 = dma.hbm_to_vmem [thread:$0]  %s305_s0, 128, %s18_s13, [#allocation3]  }
   0xd   :  { %s226_s19 = scalar_lea.vmem %s27_s15, 512  ;;  %p231_p6 = scmp.lt.s32.totalorder %s27_s15, %s27_s15 }
   0xe   :  { %p227_p5 = scmp.ne.s32.totalorder %s27_s15, %s226_s19  ;;  %p232_p7 = scmp.lt.s32.totalorder %s226_s19, %s226_s19 }
  0x10   :  { %p233_p8 = por %p232_p7, %p231_p6 }
  0x12   :  { %p234_p9 = pnand %p233_p8, %p227_p5 }
  0x14   :  { %237 = shalt.err (!%p234_p9)
}
  0x15   :  { %s266_s20 = smov 128   ;;  %s267_s21 = smov 8  }
  0x16   :  { %32 = dma.hbm_to_vmem [thread:$0]  %s306_s1, 512, %s27_s15, [#allocation6], %s266_s20, %s266_s20, %s267_s21  }
  0x17   :  { %258 = dma.done.wait [#allocation3], 128  }
  0x18   :  { %259 = vsyncadd [#allocation3], 4294967168 }
  0x19   :  { %260 = dma.done.wait [#allocation6], 512  }
  0x1a   :  { %261 = vsyncadd [#allocation6], 4294966784  ;;  %v41_v0 = vld [vmem:[#allocation2] sm:$0xff]  ;;  %vm43_vm0 = vcmask 261120   ;;  %v268_v3 = vmov 0.0   ;;  %v53_v5 = vld [vmem:[#allocation5 + $0x10] sm:$0xff]  ;;  %v136_v13 = vlaneseq }
  0x1b   :  { %v42_v1 = vmul.f32 %v41_v0, %v41_v0  ;;  %174 = vmatprep.subr.mxu0 %v268_v3  ;;  %v54_v4 = vld [vmem:[#allocation5 + $0x18] sm:$0xff]  ;;  %v52_v6 = vld [vmem:[#allocation5 + $0x8] sm:$0xff]  ;;  %v51_v7 = vld [vmem:[#allocation5] sm:$0xff]  ;;  %vm269_vm1 = vmmov 0   ;;  %s270_s24 = smov [#allocation7]  }
  0x1c   :  { %175 = vmatpush3.msra.mxu0 %v54_v4  ;;  %182 = vmatprep.mubr.msk.f32.mxu0 %vm269_vm1, %v268_v3  ;;  %v137_v14 = vand.u32 127, %v136_v13  ;;  %v168_v15 = vld [vmem:[%s307_s2] ss:$0 sm:$0xff]  ;;  %s157_s25 = sshll.u32 %s270_s24, 4  ;;  %s158_s25 = int_to_ptr.vmem [resolvable:$true] %s157_s25 }
  0x1d   :  { %v44_v2 = vsel %vm43_vm0, %v42_v1, 0.0  ;;  %176 = vmatprep.subr.mxu0 %v268_v3  ;;  %s238_s2 = scalar_lea.vmem %s158_s25, 128  ;;  %p243_p11 = scmp.lt.s32.totalorder %s158_s25, %s158_s25 }
  0x1e   :  { %45 = vadd.xlane.f32.xlu0 %v44_v2  ;;  %177 = vmatpush3.msra.mxu0 %v53_v5  ;;  %vm138_vm2 = vcmp.lt.s32.totalorder %v137_v14, 16  ;;  %p239_p10 = scmp.ne.s32.totalorder %s158_s25, %s238_s2  ;;  %p244_p12 = scmp.lt.s32.totalorder %s238_s2, %s238_s2 }
  0x1f   :  { %178 = vmatprep.subr.mxu0 %v268_v3 }
  0x20   :  { %179 = vmatpush3.msra.mxu0 %v52_v6  ;;  %p245_p13 = por %p244_p12, %p243_p11 }
  0x21   :  { %180 = vmatprep.subr.mxu0 %v268_v3 }
  0x22   :  { %181 = vmatpush3.msra.mxu0 %v51_v7  ;;  %p246_p0 = pnand %p245_p13, %p239_p10 }
  0xa7   :  { %v46_v8 = vpop.xlane.xlu0 %45 }
  0xa8   :  { %v47_v9 = vmax.f32 %v46_v8, 1e-24 }
  0xaa   :  { %192 = vrsqrt.f32 %v47_v9 }
  0xb7   :  { %v193_v10 = vpop.eup %192 }
  0xb8   :  { %v49_v11 = vmul.f32 10.0, %v193_v10 }
  0xba   :  { %v50_v12 = vmul.f32 %v49_v11, %v41_v0 }
  0xbc   :  { %183 = vmatmul.mubr.msk.f32.vlgmr.msra.gmra.mxu0 %vm43_vm0, %v50_v12 }
 0x17c   :  { %v124_v16 = vpop.f32.mrf.mxu0 }
 0x17d   :  { %v135_v17 = vmul.f32 %v168_v15, %v124_v16 }
 0x17e   :  { %v184_v18 = vpop.f32.mrf.mxu0 }
 0x17f   :  { %v139_v19 = vsel %vm138_vm2, %v135_v17, -1e+30 }
 0x180   :  { %140 = vmax.xlane.f32.xlu0 %v139_v19 }
 0x209   :  { %v141_v20 = vpop.xlane.xlu0 %140 }
 0x20a   :  { %v142_v21 = vsub.f32 %v139_v19, %v141_v20 }
 0x20c   :  { %v143_v22 = vmul.f32 1.442695, %v142_v21 }
 0x20e   :  { %194 = vpow2.f32 %v143_v22 }
 0x21b   :  { %v195_v23 = vpop.eup %194 }
 0x21c   :  { %145 = vadd.xlane.f32.xlu1 %v195_v23 }
 0x2a5   :  { %v146_v24 = vpop.xlane.xlu1 %145 }
 0x2a6   :  { %196 = vlog2.f32 %v146_v24 }
 0x2b3   :  { %v197_v25 = vpop.eup %196 }
 0x2b4   :  { %v148_v26 = vmul.f32 0.6931472, %v197_v25 }
 0x2b6   :  { %v149_v27 = vsub.f32 %v142_v21, %v148_v26 }
 0x2b8   :  { %150 = vst [vmem:[#allocation7] sm:$0xff] %v149_v27 }
 0x2b9   :  { %249 = shalt.err (!%p246_p0)
}
 0x2ba   :  { %160 = dma.vmem_to_hbm [thread:$0]  %s158_s25, 128, %s308_s3, [#allocation4]  }
 0x2bb   :  { %262 = dma.done.wait [#allocation4], 128  }
 0x2bc   :  { %263 = vsyncadd [#allocation4], 4294967168 }
 0x2bd   :  { %164 = vsyncpa [#allocation3], 1 }
 0x2be   :  { %165 = vsyncpa [#allocation6], 1 }
 0x2bf   :  { %166 = vsyncpa [#allocation4], 1 }

// kernel: tpu_custom_call.1
= control target key start
LH: loop header
LB: loop body
LE: loop exit
PB: predicated region body
PF: predicated region fallthrough
CT: control target
= control target key end

     0   :  { %8 = vsyncpa [#allocation3], 0  ;;  %s305_s0 = inlined_call_operand.hbm [shape: f32[8,32], index: 0, kind: input, shape index: {}]   ;;  %s306_s1 = inlined_call_operand.hbm [shape: f32[32,128], index: 1, kind: input, shape index: {}]   ;;  %s307_s2 = inlined_call_operand.vmem [shape: f32[1,128], index: 2, kind: input, shape index: {}]   ;;  %s308_s3 = inlined_call_operand.hbm [shape: f32[8,128], index: 3, kind: output, shape index: {}]  }
   0x1   :  { %9 = vsyncpa [#allocation6], 0 }
   0x2   :  { %10 = vsyncpa [#allocation4], 0  ;;  %s264_s12 = smov [#allocation2]   ;;  %s265_s14 = smov [#allocation5]  }
   0x3   :  { %s17_s13 = sshll.u32 %s264_s12, 4  ;;  %s26_s15 = sshll.u32 %s265_s14, 4  ;;  %s18_s13 = int_to_ptr.vmem [resolvable:$true] %s17_s13  ;;  %s27_s15 = int_to_ptr.vmem [resolvable:$true] %s26_s15 }
   0x4   :  { %s206_s16 = scalar_lea.vmem %s18_s13, 128  ;;  %p211_p1 = scmp.lt.s32.totalorder %s18_s13, %s18_s13 }
   0x5   :  { %p207_p0 = scmp.ne.s32.totalorder %s18_s13, %s206_s16  ;;  %p212_p2 = scmp.lt.s32.totalorder %s206_s16, %s206_s16 }
   0x7   :  { %p213_p3 = por %p212_p2, %p211_p1 }
   0x9   :  { %p214_p4 = pnand %p213_p3, %p207_p0 }
   0xb   :  { %217 = shalt.err (!%p214_p4)
}
   0xc   :  { %20 = dma.hbm_to_vmem [thread:$0]  %s305_s0, 128, %s18_s13, [#allocation3]  }
   0xd   :  { %s226_s19 = scalar_lea.vmem %s27_s15, 512  ;;  %p231_p6 = scmp.lt.s32.totalorder %s27_s15, %s27_s15 }
   0xe   :  { %p227_p5 = scmp.ne.s32.totalorder %s27_s15, %s226_s19  ;;  %p232_p7 = scmp.lt.s32.totalorder %s226_s19, %s226_s19 }
  0x10   :  { %p233_p8 = por %p232_p7, %p231_p6 }
  0x12   :  { %p234_p9 = pnand %p233_p8, %p227_p5 }
  0x14   :  { %237 = shalt.err (!%p234_p9)
}
  0x15   :  { %s266_s20 = smov 128   ;;  %s267_s21 = smov 8  }
  0x16   :  { %32 = dma.hbm_to_vmem [thread:$0]  %s306_s1, 512, %s27_s15, [#allocation6], %s266_s20, %s266_s20, %s267_s21  }
  0x17   :  { %258 = dma.done.wait [#allocation3], 128  }
  0x18   :  { %259 = vsyncadd [#allocation3], 4294967168 }
  0x19   :  { %260 = dma.done.wait [#allocation6], 512  }
  0x1a   :  { %261 = vsyncadd [#allocation6], 4294966784  ;;  %v41_v0 = vld [vmem:[#allocation2] sm:$0xff]  ;;  %vm43_vm0 = vcmask 261120   ;;  %v268_v3 = vmov 0.0   ;;  %v53_v5 = vld [vmem:[#allocation5 + $0x10] sm:$0xff]  ;;  %v136_v13 = vlaneseq }
  0x1b   :  { %v42_v1 = vmul.f32 %v41_v0, %v41_v0  ;;  %174 = vmatprep.subr.mxu0 %v268_v3  ;;  %v54_v4 = vld [vmem:[#allocation5 + $0x18] sm:$0xff]  ;;  %v52_v6 = vld [vmem:[#allocation5 + $0x8] sm:$0xff]  ;;  %v51_v7 = vld [vmem:[#allocation5] sm:$0xff]  ;;  %vm269_vm1 = vmmov 0   ;;  %s270_s24 = smov [#allocation7]  }
  0x1c   :  { %175 = vmatpush3.msra.mxu0 %v54_v4  ;;  %182 = vmatprep.mubr.msk.f32.mxu0 %vm269_vm1, %v268_v3  ;;  %v137_v14 = vand.u32 127, %v136_v13  ;;  %v168_v15 = vld [vmem:[%s307_s2] ss:$0 sm:$0xff]  ;;  %s157_s25 = sshll.u32 %s270_s24, 4  ;;  %s158_s25 = int_to_ptr.vmem [resolvable:$true] %s157_s25 }
  0x1d   :  { %v44_v2 = vsel %vm43_vm0, %v42_v1, 0.0  ;;  %176 = vmatprep.subr.mxu0 %v268_v3  ;;  %s238_s2 = scalar_lea.vmem %s158_s25, 128  ;;  %p243_p11 = scmp.lt.s32.totalorder %s158_s25, %s158_s25 }
  0x1e   :  { %45 = vadd.xlane.f32.xlu0 %v44_v2  ;;  %177 = vmatpush3.msra.mxu0 %v53_v5  ;;  %vm138_vm2 = vcmp.lt.s32.totalorder %v137_v14, 16  ;;  %p239_p10 = scmp.ne.s32.totalorder %s158_s25, %s238_s2  ;;  %p244_p12 = scmp.lt.s32.totalorder %s238_s2, %s238_s2 }
  0x1f   :  { %178 = vmatprep.subr.mxu0 %v268_v3 }
  0x20   :  { %179 = vmatpush3.msra.mxu0 %v52_v6  ;;  %p245_p13 = por %p244_p12, %p243_p11 }
  0x21   :  { %180 = vmatprep.subr.mxu0 %v268_v3 }
  0x22   :  { %181 = vmatpush3.msra.mxu0 %v51_v7  ;;  %p246_p0 = pnand %p245_p13, %p239_p10 }
  0xa7   :  { %v46_v8 = vpop.xlane.xlu0 %45 }
  0xa8   :  { %v47_v9 = vmax.f32 %v46_v8, 1e-24 }
  0xaa   :  { %192 = vrsqrt.f32 %v47_v9 }
  0xb7   :  { %v193_v10 = vpop.eup %192 }
  0xb8   :  { %v49_v11 = vmul.f32 10.0, %v193_v10 }
  0xba   :  { %v50_v12 = vmul.f32 %v49_v11, %v41_v0 }
  0xbc   :  { %183 = vmatmul.mubr.msk.f32.vlgmr.msra.gmra.mxu0 %vm43_vm0, %v50_v12 }
 0x17c   :  { %v124_v16 = vpop.f32.mrf.mxu0 }
 0x17d   :  { %v135_v17 = vmul.f32 %v168_v15, %v124_v16 }
 0x17e   :  { %v184_v18 = vpop.f32.mrf.mxu0 }
 0x17f   :  { %v139_v19 = vsel %vm138_vm2, %v135_v17, -1e+30 }
 0x180   :  { %140 = vmax.xlane.f32.xlu0 %v139_v19 }
 0x209   :  { %v141_v20 = vpop.xlane.xlu0 %140 }
 0x20a   :  { %v142_v21 = vsub.f32 %v139_v19, %v141_v20 }
 0x20c   :  { %v143_v22 = vmul.f32 1.442695, %v142_v21 }
 0x20e   :  { %194 = vpow2.f32 %v143_v22 }
 0x21b   :  { %v195_v23 = vpop.eup %194 }
 0x21c   :  { %145 = vadd.xlane.f32.xlu1 %v195_v23 }
 0x2a5   :  { %v146_v24 = vpop.xlane.xlu1 %145 }
 0x2a6   :  { %196 = vlog2.f32 %v146_v24 }
 0x2b3   :  { %v197_v25 = vpop.eup %196 }
 0x2b4   :  { %v148_v26 = vmul.f32 0.6931472, %v197_v25 }
 0x2b6   :  { %v149_v27 = vsub.f32 %v142_v21, %v148_v26 }
 0x2b8   :  { %150 = vst [vmem:[#allocation7] sm:$0xff] %v149_v27 }
 0x2b9   :  { %249 = shalt.err (!%p246_p0)
}
 0x2ba   :  { %160 = dma.vmem_to_hbm [thread:$0]  %s158_s25, 128, %s308_s3, [#allocation4]  }
 0x2bb   :  { %262 = dma.done.wait [#allocation4], 128  }
 0x2bc   :  { %263 = vsyncadd [#allocation4], 4294967168 }
 0x2bd   :  { %164 = vsyncpa [#allocation3], 1 }
 0x2be   :  { %165 = vsyncpa [#allocation6], 1 }
 0x2bf   :  { %166 = vsyncpa [#allocation4], 1 }

</bundles_post_ra>
